<compile_context>
chip_gen: v6e
topology: v6e:2x2x1
jax: 0.10.0
libtpu: 0.0.40
codegen_flags: <defaults>
</compile_context>

<pallas_src>
from typing import NamedTuple

import jax
import jax.numpy as jnp
from jax import lax
from jax.experimental import pallas as pl
from jax.experimental.pallas import tpu as pltpu


# ---------------------------------------------------------------------------
# Kernel
# ---------------------------------------------------------------------------
def _qhead_kernel(x_ref, w_ref, b_ref, o_ref):
    # x_ref: (tm, D)      compute dtype (f32 or bf16)
    # w_ref: (A_pad, D)   compute dtype, nn.Linear layout (no wrapper transpose)
    # b_ref: (1, A_pad)   f32
    # o_ref: (tm, A_pad)  f32, lane-dense (A_pad % 128 == 0)
    acc = lax.dot_general(
        x_ref[...], w_ref[...],
        dimension_numbers=(((1,), (1,)), ((), ())),   # contract on D; MXU handles transposed RHS
        preferred_element_type=jnp.float32,
    )                                                  # (tm, A_pad) f32
    o_ref[...] = (acc + b_ref[...]).astype(o_ref.dtype)


# ---------------------------------------------------------------------------
# Parameters (prep done ONCE at init, not per forward)
# ---------------------------------------------------------------------------
class QHeadParams(NamedTuple):
    weight: jax.Array    # (A_pad, D) compute dtype; rows >= n_actions are zero
    bias: jax.Array      # (1, A_pad) f32; lanes >= n_actions are zero
    n_actions: int


def _round_up(x, m):
    return ((x + m - 1) // m) * m


def init_qhead_params(weight, bias, *, compute_dtype=jnp.float32):
    """Pad action axis to a multiple of 128 and cast once, at init time."""
    A, D = weight.shape
    A_pad = _round_up(A, 128)
    w_p = jnp.zeros((A_pad, D), compute_dtype).at[:A, :].set(weight.astype(compute_dtype))
    b_p = jnp.zeros((1, A_pad), jnp.float32).at[0, :A].set(bias.astype(jnp.float32))
    return QHeadParams(weight=w_p, bias=b_p, n_actions=A)


# ---------------------------------------------------------------------------
# Tiling / dispatch heuristics
# ---------------------------------------------------------------------------
_TM_MAX = 256                    # batch-tile ceiling (keeps v5e's single vst slot happy)
_VMEM_BUDGET = 16 * 1024 * 1024  # conservative: fits v7x's 32 MiB default scoped VMEM


def _pick_batch_tile(B, D, A_pad, in_itemsize):
    # Double-buffered x tile + double-buffered f32 output tile per batch row,
    # plus the resident weight/bias.
    per_row = 2 * D * in_itemsize + 2 * A_pad * 4
    resident = D * A_pad * in_itemsize + A_pad * 4
    cap = max(8, (_VMEM_BUDGET - resident) // per_row)
    if B <= min(_TM_MAX, cap):
        return B                                  # block dim == full array dim is always legal
    tm = min(_TM_MAX, cap, B)
    return max(8, (tm // 8) * 8)                  # sublane-aligned


def _mxu_scale(B, D):
    # Pallas path only when the matmul can actually feed the MXU.
    return B >= 128 and D >= 128 and D % 128 == 0


# ---------------------------------------------------------------------------
# Forward
# ---------------------------------------------------------------------------
def _qhead_forward_pallas(x, w_p, b_p):
    B, D = x.shape
    A_pad = w_p.shape[0]
    compute_dtype = w_p.dtype
    x_c = x.astype(compute_dtype)                 # bf16 feed on v6e/v7x; f32 otherwise
    tm = _pick_batch_tile(B, D, A_pad, jnp.dtype(compute_dtype).itemsize)

    return pl.pallas_call(
        _qhead_kernel,
        out_shape=jax.ShapeDtypeStruct((B, A_pad), jnp.float32),
        grid=(pl.cdiv(B, tm),),
        in_specs=[
            pl.BlockSpec((tm, D), lambda i: (i, 0)),       # x: tiled over batch
            pl.BlockSpec((A_pad, D), lambda i: (0, 0)),    # weight: resident
            pl.BlockSpec((1, A_pad), lambda i: (0, 0)),    # bias: resident
        ],
        out_specs=pl.BlockSpec((tm, A_pad), lambda i: (i, 0)),  # lane-dense output
        compiler_params=pltpu.CompilerParams(
            dimension_semantics=("parallel",),             # batch axis splits across cores
        ),
    )(x_c, w_p, b_p)


def qhead_forward(params: QHeadParams, x, *, force_pallas=False):
    """q = x @ W.T + b  (PyTorch nn.Linear semantics)."""
    B, D = x.shape
    A = params.n_actions
    if not (force_pallas or _mxu_scale(B, D)):
        # Tiny shapes: pallas_call launch/DMA overhead dominates; let XLA fuse dot+bias.
        w = params.weight[:A].astype(jnp.float32)          # (A, D)
        return x.astype(jnp.float32) @ w.T + params.bias[0, :A]
    q_pad = _qhead_forward_pallas(x, params.weight, params.bias)
    # Drop padded action lanes BEFORE any downstream argmax (padded q == 0 could
    # otherwise win an argmax over all-negative real Q-values).
    return q_pad[:, :A]


def qhead_sample(q_values):
    """Greedy part of epsilon-greedy: argmax over the action axis (plain JAX)."""
    return jnp.argmax(q_values, axis=1)


def orthogonal_init(key, shape, gain=1.0, dtype=jnp.float32):
    """Matches torch.nn.init.orthogonal_ semantics (used by reset_weights)."""
    rows, cols = shape
    flat_shape = (rows, cols) if rows >= cols else (cols, rows)
    a = jax.random.normal(key, flat_shape, dtype=jnp.float32)
    q, r = jnp.linalg.qr(a)
    q = q * jnp.sign(jnp.diag(r))                 # make decomposition unique
    if rows < cols:
        q = q.T
    return (gain * q[:rows, :cols]).astype(dtype)


# ---------------------------------------------------------------------------
# Demo / correctness check
# ---------------------------------------------------------------------------
if __name__ == "__main__":
    key = jax.random.PRNGKey(0)
    k_x, k_w, k_x2, k_w2 = jax.random.split(key, 4)

    # Module-consistent small shapes: QHead(input_dim=32, Discrete(6)), batch=2.
    batch, input_dim, n_actions = 2, 32, 6
    x = jax.random.normal(k_x, (batch, input_dim), dtype=jnp.float32)

    # reset_weights(): orthogonal_(weight, gain=1.0), constant_(bias, 0.0)
    weight = orthogonal_init(k_w, (n_actions, input_dim), gain=1.0)   # (A, D)
    bias = jnp.zeros((n_actions,), dtype=jnp.float32)

    # Init-time prep (padding / casting happens once here, not per forward).
    params = init_qhead_params(weight, bias, compute_dtype=jnp.float32)

    # 1) Tiny shape, forced through the Pallas path (exercise the kernel).
    q = jax.block_until_ready(qhead_forward(params, x, force_pallas=True))
    q_ref = x @ weight.T + bias
    assert q.shape == (batch, n_actions)
    assert jnp.allclose(q, q_ref, atol=1e-5, rtol=1e-5), "pallas path mismatch"

    # Dispatch guard: same call without force falls back to fused XLA dot+add.
    q_guard = jax.block_until_ready(qhead_forward(params, x))
    assert jnp.allclose(q_guard, q_ref, atol=1e-5, rtol=1e-5), "fallback path mismatch"

    # 2) MXU-scale shapes: batch-tiled grid (grid=(2,)), bf16 feed / f32 accumulate.
    B2, D2 = 512, 128
    x2 = jax.random.normal(k_x2, (B2, D2), dtype=jnp.float32)
    w2 = orthogonal_init(k_w2, (n_actions, D2), gain=1.0)
    params_bf16 = init_qhead_params(w2, bias, compute_dtype=jnp.bfloat16)
    q2 = jax.block_until_ready(qhead_forward(params_bf16, x2))       # guard routes to Pallas
    x2_b = x2.astype(jnp.bfloat16).astype(jnp.float32)
    w2_b = w2.astype(jnp.bfloat16).astype(jnp.float32)
    q2_ref = lax.dot_general(x2_b, w2_b, (((1,), (1,)), ((), ())),
                             precision=lax.Precision.HIGHEST) + bias
    assert q2.shape == (B2, n_actions)
    assert jnp.allclose(q2, q2_ref, atol=1e-3, rtol=1e-3), "bf16 tiled path mismatch"

    # sample() = argmax over actions (on the already-sliced q; padded lanes never seen).
    actions = jax.block_until_ready(qhead_sample(q))
    assert actions.shape == (batch,)
    actions2 = jax.block_until_ready(qhead_sample(q2))
    assert actions2.shape == (B2,)
    assert bool(jnp.all(actions2 < n_actions))

    print("KERNEL_OK")
</pallas_src>

<mosaic_0001>
module attributes {stable_mosaic.version = 11 : i64} {
  func.func @_qhead_kernel(%arg0: i32, %arg1: memref<2x32xf32, #tpu.memory_space<vmem>>, %arg2: memref<128x32xf32, #tpu.memory_space<vmem>>, %arg3: memref<1x128xf32, #tpu.memory_space<vmem>>, %arg4: memref<2x128xf32, #tpu.memory_space<vmem>>) attributes {dimension_semantics = [#tpu.dimension_semantics<parallel>], iteration_bounds = array<i64: 1>, scalar_prefetch = 0 : i64, scratch_operands = 0 : i64, tpu.core_type = #tpu.core_type<tc>, window_params = [{transform_indices = @transform_0, window_bounds = array<i64: 2, 32>}, {pipeline_mode = #tpu.pipeline_mode<synchronous>, transform_indices = @transform_1, window_bounds = array<i64: 128, 32>}, {pipeline_mode = #tpu.pipeline_mode<synchronous>, transform_indices = @transform_2, window_bounds = array<i64: 1, 128>}, {transform_indices = @transform_3, window_bounds = array<i64: 2, 128>}]} {
    %c0 = arith.constant 0 : index
    %c0_0 = arith.constant 0 : index
    %0 = vector.load %arg1[%c0, %c0_0] : memref<2x32xf32, #tpu.memory_space<vmem>>, vector<2x32xf32>
    %c0_1 = arith.constant 0 : index
    %c0_2 = arith.constant 0 : index
    %1 = vector.load %arg2[%c0_1, %c0_2] : memref<128x32xf32, #tpu.memory_space<vmem>>, vector<128x32xf32>
    %cst = arith.constant dense<0.000000e+00> : vector<2x128xf32>
    %2 = tpu.matmul %0, %1, %cst {dimension_numbers = #tpu.dot_dimension_numbers<[1], [1], [0], [0], [0, 0, 1, 0], [], []>} : vector<2x32xf32>, vector<128x32xf32>, vector<2x128xf32> -> vector<2x128xf32>
    %c0_3 = arith.constant 0 : index
    %c0_4 = arith.constant 0 : index
    %3 = vector.load %arg3[%c0_3, %c0_4] : memref<1x128xf32, #tpu.memory_space<vmem>>, vector<1x128xf32>
    %4 = vector.broadcast %3 : vector<1x128xf32> to vector<2x128xf32>
    %5 = arith.addf %2, %4 : vector<2x128xf32>
    %c0_5 = arith.constant 0 : index
    %c0_6 = arith.constant 0 : index
    %6 = vector.load %arg4[%c0_5, %c0_6] : memref<2x128xf32, #tpu.memory_space<vmem>>, vector<2x128xf32>
    tpu.vector_store %arg4[%c0_5, %c0_6], %5 {strides = array<i32>} : memref<2x128xf32, #tpu.memory_space<vmem>>, vector<2x128xf32>,
    return
  }
  func.func @transform_0(%arg0: i32) -> (i32, i32) {
    %c0_i32 = arith.constant 0 : i32
    %c0_i32_0 = arith.constant 0 : i32
    return %arg0, %c0_i32 : i32, i32
  }
  func.func @transform_1(%arg0: i32) -> (i32, i32) {
    %c0_i32 = arith.constant 0 : i32
    %c0_i32_0 = arith.constant 0 : i32
    %c0_i32_1 = arith.constant 0 : i32
    return %c0_i32, %c0_i32_0 : i32, i32
  }
  func.func @transform_2(%arg0: i32) -> (i32, i32) {
    %c0_i32 = arith.constant 0 : i32
    %c0_i32_0 = arith.constant 0 : i32
    %c0_i32_1 = arith.constant 0 : i32
    return %c0_i32, %c0_i32_0 : i32, i32
  }
  func.func @transform_3(%arg0: i32) -> (i32, i32) {
    %c0_i32 = arith.constant 0 : i32
    %c0_i32_0 = arith.constant 0 : i32
    return %arg0, %c0_i32 : i32, i32
  }
}

</mosaic_0001>

<bundles_post_ra>
// kernel: tpu_custom_call.1
= control target key start
LH: loop header
LB: loop body
LE: loop exit
PB: predicated region body
PF: predicated region fallthrough
CT: control target
= control target key end

     0   :  { %vm39_vm0 = vcmask 261120   ;;  %v271_v1 = vmov 0.0   ;;  %vm272_vm1 = vmmov 0   ;;  %s368_s0 = inlined_call_operand.vmem [shape: f32[2,32], index: 0, kind: input, shape index: {}]   ;;  %s369_s1 = inlined_call_operand.vmem [shape: f32[128,32], index: 1, kind: input, shape index: {}]   ;;  %s370_s2 = inlined_call_operand.vmem [shape: f32[1,128], index: 2, kind: input, shape index: {}]   ;;  %s371_s3 = inlined_call_operand.hbm [shape: f32[2,128], index: 3, kind: output, shape index: {}]  }
   0x1   :  { %v31_v0 = vld [vmem:[%s369_s1 + $0x78] sm:$0xff]  ;;  %211 = vmatprep.subr.mxu0 %v271_v1  ;;  %243 = vmatprep.mubr.msk.f32.mxu0 %vm272_vm1, %v271_v1  ;;  %v30_v2 = vld [vmem:[%s369_s1 + $0x70] sm:$0xff] }
   0x2   :  { %212 = vmatpush3.xpose.msk.msra.mxu0 %vm39_vm0, %v31_v0 }
   0x3   :  { %213 = vmatprep.subr.mxu0 %v271_v1 }
   0x6   :  { %214 = vmatpush3.xpose.msk.msra.mxu0 %vm39_vm0, %v30_v2 }
   0x7   :  { %8 = vsyncpa [#allocation3], 0  ;;  %215 = vmatprep.subr.mxu0 %v271_v1  ;;  %v29_v3 = vld [vmem:[%s369_s1 + $0x68] sm:$0xff]  ;;  %v28_v4 = vld [vmem:[%s369_s1 + $0x60] sm:$0xff]  ;;  %s273_s21 = smov [#allocation2]  }
   0x8   :  { %v27_v5 = vld [vmem:[%s369_s1 + $0x58] sm:$0xff]  ;;  %v26_v6 = vld [vmem:[%s369_s1 + $0x50] sm:$0xff]  ;;  %v25_v7 = vld [vmem:[%s369_s1 + $0x48] sm:$0xff]  ;;  %s168_s22 = sshll.u32 %s273_s21, 4  ;;  %s169_s22 = int_to_ptr.vmem [resolvable:$true] %s168_s22 }
   0x9   :  { %v24_v8 = vld [vmem:[%s369_s1 + $0x40] sm:$0xff]  ;;  %v23_v9 = vld [vmem:[%s369_s1 + $0x38] sm:$0xff]  ;;  %v22_v10 = vld [vmem:[%s369_s1 + $0x30] sm:$0xff]  ;;  %p254_p1 = scmp.lt.s32.totalorder %s169_s22, %s169_s22 }
   0xa   :  { %216 = vmatpush3.xpose.msk.msra.mxu0 %vm39_vm0, %v29_v3  ;;  %v21_v11 = vld [vmem:[%s369_s1 + $0x28] sm:$0xff]  ;;  %v20_v12 = vld [vmem:[%s369_s1 + $0x20] sm:$0xff]  ;;  %v19_v13 = vld [vmem:[%s369_s1 + $0x18] sm:$0xff] }
   0xb   :  { %217 = vmatprep.subr.mxu0 %v271_v1  ;;  %v18_v14 = vld [vmem:[%s369_s1 + $0x10] sm:$0xff]  ;;  %v17_v15 = vld [vmem:[%s369_s1 + $0x8] sm:$0xff]  ;;  %v16_v16 = vld [vmem:[%s369_s1] sm:$0xff]  ;;  %s249_s1 = scalar_lea.vmem %s169_s22, 32 }
   0xc   :  { %v15_v17 = vld [vmem:[%s368_s0] sm:$0x3]  ;;  %p250_p0 = scmp.ne.s32.totalorder %s169_s22, %s249_s1  ;;  %p255_p2 = scmp.lt.s32.totalorder %s249_s1, %s249_s1 }
   0xd   :  { %v176_v18 = vld [vmem:[%s370_s2] ss:$0 sm:$0xff] }
   0xe   :  { %218 = vmatpush3.xpose.msk.msra.mxu0 %vm39_vm0, %v28_v4  ;;  %p256_p3 = por %p255_p2, %p254_p1 }
   0xf   :  { %219 = vmatprep.subr.mxu0 %v271_v1 }
  0x10   :  { %p257_p4 = pnand %p256_p3, %p250_p0 }
  0x12   :  { %220 = vmatpush3.xpose.msk.msra.mxu0 %vm39_vm0, %v27_v5 }
  0x13   :  { %221 = vmatprep.subr.mxu0 %v271_v1 }
  0x16   :  { %222 = vmatpush3.xpose.msk.msra.mxu0 %vm39_vm0, %v26_v6 }
  0x17   :  { %223 = vmatprep.subr.mxu0 %v271_v1 }
  0x1a   :  { %224 = vmatpush3.xpose.msk.msra.mxu0 %vm39_vm0, %v25_v7 }
  0x1b   :  { %225 = vmatprep.subr.mxu0 %v271_v1 }
  0x1e   :  { %226 = vmatpush3.xpose.msk.msra.mxu0 %vm39_vm0, %v24_v8 }
  0x1f   :  { %227 = vmatprep.subr.mxu0 %v271_v1 }
  0x22   :  { %228 = vmatpush3.xpose.msk.msra.mxu0 %vm39_vm0, %v23_v9 }
  0x23   :  { %229 = vmatprep.subr.mxu0 %v271_v1 }
  0x26   :  { %230 = vmatpush3.xpose.msk.msra.mxu0 %vm39_vm0, %v22_v10 }
  0x27   :  { %231 = vmatprep.subr.mxu0 %v271_v1 }
  0x2a   :  { %232 = vmatpush3.xpose.msk.msra.mxu0 %vm39_vm0, %v21_v11 }
  0x2b   :  { %233 = vmatprep.subr.mxu0 %v271_v1 }
  0x2e   :  { %234 = vmatpush3.xpose.msk.msra.mxu0 %vm39_vm0, %v20_v12 }
  0x2f   :  { %235 = vmatprep.subr.mxu0 %v271_v1 }
  0x32   :  { %236 = vmatpush3.xpose.msk.msra.mxu0 %vm39_vm0, %v19_v13 }
  0x33   :  { %237 = vmatprep.subr.mxu0 %v271_v1 }
  0x36   :  { %238 = vmatpush3.xpose.msk.msra.mxu0 %vm39_vm0, %v18_v14 }
  0x37   :  { %239 = vmatprep.subr.mxu0 %v271_v1 }
  0x3a   :  { %240 = vmatpush3.xpose.msk.msra.mxu0 %vm39_vm0, %v17_v15 }
  0x3b   :  { %241 = vmatprep.subr.mxu0 %v271_v1 }
  0x3e   :  { %242 = vmatpush3.xpose.msk.msra.mxu0 %vm39_vm0, %v16_v16 }
  0x41   :  { %244 = vmatmul.mubr.msk.f32.vlgmr.msra.gmra.mxu0 %vm39_vm0, %v15_v17 }
 0x101   :  { %v157_v19 = vpop.f32.mrf.mxu0 }
 0x102   :  { %v158_v20 = vadd.f32 %v176_v18, %v157_v19 }
 0x103   :  { %v245_v21 = vpop.f32.mrf.mxu0 }
 0x104   :  { %161 = vst [vmem:[#allocation2] sm:$0x3] %v158_v20 }
 0x105   :  { %260 = shalt.err (!%p257_p4)
}
 0x106   :  { %171 = dma.vmem_to_hbm [thread:$0]  %s169_s22, 32, %s371_s3, [#allocation3]  }
 0x107   :  { %269 = dma.done.wait [#allocation3], 32  }
 0x108   :  { %270 = vsyncadd [#allocation3], 4294967264 }
 0x109   :  { %175 = vsyncpa [#allocation3], 1 }

</bundles_post_ra>
